<compile_context>
chip_gen: v5e
topology: v5e:2x2
jax: 0.10.0
libtpu: 0.0.40
codegen_flags: <defaults>
</compile_context>

<pallas_src>
import jax
import jax.numpy as jnp
from jax.experimental import pallas as pl
from jax.experimental.pallas import tpu as pltpu

EPS = 1e-5


def _mlp_head_kernel(pooled_ref, w1_ref, w2_ref, aff_ref, o_ref):
    # pooled (B, C) f32, w1 (C, C) bf16, w2 (C, F) bf16,
    # aff (3, max(C, F)) f32 = [gamma; beta; bias2(padded)], out (B, F) f32.
    C = w1_ref.shape[1]
    F = w2_ref.shape[1]

    pooled = pooled_ref[...]                                          # (B, C) f32

    # --- linear1 (no bias): bf16 operands, f32 accumulation on the MXU ---
    h = jnp.dot(pooled.astype(jnp.bfloat16), w1_ref[...],
                preferred_element_type=jnp.float32)                   # (B, C)

    # --- BatchNorm1d (training-mode batch statistics), all f32 ---
    gamma = aff_ref[0:1, :C]                                          # (1, C)
    beta = aff_ref[1:2, :C]                                           # (1, C)
    b2 = aff_ref[2:3, :F]                                             # (1, F)

    mu = jnp.mean(h, axis=0, keepdims=True)                           # (1, C)
    var = jnp.mean(h * h, axis=0, keepdims=True) - mu * mu            # (1, C)
    var = jnp.maximum(var, 0.0)                                       # guard f32 cancellation
    scale = gamma * jax.lax.rsqrt(var + EPS)                          # (1, C)
    shift = beta - mu * scale                                         # (1, C)

    # --- affine BN + ReLU as one FMA-shaped op per element ---
    h = jnp.maximum(h * scale + shift, 0.0)                           # (B, C)

    # --- linear2 (with bias): bf16 operands, f32 accumulation ---
    out = jnp.dot(h.astype(jnp.bfloat16), w2_ref[...],
                  preferred_element_type=jnp.float32) + b2            # (B, F)

    o_ref[...] = out.astype(o_ref.dtype)


def prepare_params(params, in_channels, num_features):
    """One-time parameter prep (hoisted out of the per-call hot path)."""
    P = max(in_channels, num_features)
    aff = jnp.zeros((3, P), jnp.float32)
    aff = aff.at[0, :in_channels].set(params["gamma"])
    aff = aff.at[1, :in_channels].set(params["beta"])
    aff = aff.at[2, :num_features].set(params["b2"])
    return {
        "w1": params["w1"].astype(jnp.bfloat16),   # (C, C)
        "w2": params["w2"].astype(jnp.bfloat16),   # (C, F)
        "aff": aff,                                # (3, P) f32
    }


def mlp_head(x, prepared):
    """x: (B, C, H, W) float32 (NCHW, as in PyTorch). Returns (B, num_features)."""
    B = x.shape[0]
    F = prepared["w2"].shape[1]

    # Global average pool hoisted to XLA: contiguous minor-dim reduce on NCHW,
    # feeds the kernel only the 4 KB (B, C) pooled tensor (no transpose op).
    pooled = jnp.mean(x, axis=(2, 3))                                 # (B, C) f32

    args = (pooled, prepared["w1"], prepared["w2"], prepared["aff"])

    def full_spec(a):
        nd = a.ndim
        return pl.BlockSpec(a.shape, lambda *_: (0,) * nd)

    return pl.pallas_call(
        _mlp_head_kernel,
        out_shape=jax.ShapeDtypeStruct((B, F), jnp.float32),
        grid_spec=pltpu.PrefetchScalarGridSpec(
            num_scalar_prefetch=0,
            grid=(1,),
            in_specs=[full_spec(a) for a in args],
            out_specs=pl.BlockSpec((B, F), lambda *_: (0, 0)),
        ),
        compiler_params=pltpu.CompilerParams(
            dimension_semantics=("arbitrary",),
            vmem_limit_bytes=1 << 20,   # working set ~150 KB; don't hog scoped VMEM
        ),
    )(*args)


def init_params(key, in_channels=128, num_features=128):
    """Synthetic parameters matching MLPHead shapes (weights stored as (in, out))."""
    ks = jax.random.split(key, 5)

    def unif(k, shape, bound):
        return jax.random.uniform(k, shape, jnp.float32, -bound, bound)

    bw1 = 1.0 / (in_channels ** 0.5)
    return {
        # linear1: Linear(in_channels, in_channels, bias=False), stored (in, out)
        "w1": unif(ks[0], (in_channels, in_channels), bw1),
        # bnorm1 affine (random affine for a stronger numerical test)
        "gamma": unif(ks[1], (in_channels,), 1.0) + 1.0,
        "beta": unif(ks[2], (in_channels,), 0.5),
        # linear2: Linear(in_channels, num_features, bias=True), stored (in, out)
        "w2": unif(ks[3], (in_channels, num_features), bw1),
        "b2": unif(ks[4], (num_features,), bw1),
    }


def _reference(x, params):
    """Pure-JAX reference (same bf16 weight cast, f32 accumulation/BN)."""
    pooled = x.mean(axis=(2, 3))                                      # (B, C)
    w1 = params["w1"].astype(jnp.bfloat16)
    w2 = params["w2"].astype(jnp.bfloat16)
    h = jnp.dot(pooled.astype(jnp.bfloat16), w1,
                preferred_element_type=jnp.float32)
    mu = h.mean(axis=0, keepdims=True)
    var = ((h - mu) ** 2).mean(axis=0, keepdims=True)
    h = (h - mu) / jnp.sqrt(var + EPS) * params["gamma"] + params["beta"]
    h = jnp.maximum(h, 0.0)
    return jnp.dot(h.astype(jnp.bfloat16), w2,
                   preferred_element_type=jnp.float32) + params["b2"]


if __name__ == "__main__":
    key = jax.random.PRNGKey(0)
    k_x, k_p = jax.random.split(key)

    B, C, H, W, F = 8, 128, 4, 4, 128
    x = jax.random.normal(k_x, (B, C, H, W), jnp.float32)
    params = init_params(k_p, in_channels=C, num_features=F)

    # One-time parameter preparation (bf16 weights + packed affine slab).
    prepared = prepare_params(params, in_channels=C, num_features=F)

    out = mlp_head(x, prepared)
    out = jax.block_until_ready(out)

    ref = _reference(x, params)
    assert out.shape == (B, F)
    assert jnp.allclose(out, ref, atol=1e-2, rtol=1e-2), "mismatch vs reference"

    print("KERNEL_OK")
</pallas_src>

<mosaic_0001>
module attributes {stable_mosaic.version = 11 : i64} {
  func.func @_mlp_head_kernel(%arg0: i32, %arg1: memref<8x128xf32, #tpu.memory_space<vmem>>, %arg2: memref<128x128xbf16, #tpu.memory_space<vmem>>, %arg3: memref<128x128xbf16, #tpu.memory_space<vmem>>, %arg4: memref<3x128xf32, #tpu.memory_space<vmem>>, %arg5: memref<8x128xf32, #tpu.memory_space<vmem>>) attributes {dimension_semantics = [#tpu.dimension_semantics<arbitrary>], iteration_bounds = array<i64: 1>, scalar_prefetch = 0 : i64, scratch_operands = 0 : i64, tpu.core_type = #tpu.core_type<tc>, window_params = [{pipeline_mode = #tpu.pipeline_mode<synchronous>, transform_indices = @transform_0, window_bounds = array<i64: 8, 128>}, {pipeline_mode = #tpu.pipeline_mode<synchronous>, transform_indices = @transform_1, window_bounds = array<i64: 128, 128>}, {pipeline_mode = #tpu.pipeline_mode<synchronous>, transform_indices = @transform_2, window_bounds = array<i64: 128, 128>}, {pipeline_mode = #tpu.pipeline_mode<synchronous>, transform_indices = @transform_3, window_bounds = array<i64: 3, 128>}, {pipeline_mode = #tpu.pipeline_mode<synchronous>, transform_indices = @transform_4, window_bounds = array<i64: 8, 128>}]} {
    %c0 = arith.constant 0 : index
    %c0_0 = arith.constant 0 : index
    %0 = vector.load %arg1[%c0, %c0_0] : memref<8x128xf32, #tpu.memory_space<vmem>>, vector<8x128xf32>
    %1 = arith.truncf %0 : vector<8x128xf32> to vector<8x128xbf16>
    %c0_1 = arith.constant 0 : index
    %c0_2 = arith.constant 0 : index
    %2 = vector.load %arg2[%c0_1, %c0_2] : memref<128x128xbf16, #tpu.memory_space<vmem>>, vector<128x128xbf16>
    %cst = arith.constant dense<0.000000e+00> : vector<8x128xf32>
    %3 = tpu.matmul %1, %2, %cst {dimension_numbers = #tpu.dot_dimension_numbers<[1], [0], [0], [1], [0, 0, 1, 1], [], []>} : vector<8x128xbf16>, vector<128x128xbf16>, vector<8x128xf32> -> vector<8x128xf32>
    %c0_3 = arith.constant 0 : index
    %c0_4 = arith.constant 0 : index
    %4 = vector.load %arg4[%c0_3, %c0_4] : memref<3x128xf32, #tpu.memory_space<vmem>>, vector<1x128xf32>
    %c1 = arith.constant 1 : index
    %c0_5 = arith.constant 0 : index
    %5 = vector.load %arg4[%c1, %c0_5] : memref<3x128xf32, #tpu.memory_space<vmem>>, vector<1x128xf32>
    %c2 = arith.constant 2 : index
    %c0_6 = arith.constant 0 : index
    %6 = vector.load %arg4[%c2, %c0_6] : memref<3x128xf32, #tpu.memory_space<vmem>>, vector<1x128xf32>
    %cst_7 = arith.constant dense<0.000000e+00> : vector<128xf32>
    %7 = vector.multi_reduction <add>, %3, %cst_7 [0] : vector<8x128xf32> to vector<128xf32>
    %8 = vector.shape_cast %7 : vector<128xf32> to vector<1x128xf32>
    %cst_8 = arith.constant 8.000000e+00 : f32
    %9 = vector.broadcast %cst_8 : f32 to vector<1x128xf32>
    %10 = arith.divf %8, %9 : vector<1x128xf32>
    %11 = arith.mulf %3, %3 : vector<8x128xf32>
    %cst_9 = arith.constant dense<0.000000e+00> : vector<128xf32>
    %12 = vector.multi_reduction <add>, %11, %cst_9 [0] : vector<8x128xf32> to vector<128xf32>
    %13 = vector.shape_cast %12 : vector<128xf32> to vector<1x128xf32>
    %cst_10 = arith.constant 8.000000e+00 : f32
    %14 = vector.broadcast %cst_10 : f32 to vector<1x128xf32>
    %15 = arith.divf %13, %14 : vector<1x128xf32>
    %16 = arith.mulf %10, %10 : vector<1x128xf32>
    %17 = arith.subf %15, %16 : vector<1x128xf32>
    %cst_11 = arith.constant 0.000000e+00 : f32
    %18 = vector.broadcast %cst_11 : f32 to vector<1x128xf32>
    %19 = arith.maximumf %17, %18 : vector<1x128xf32>
    %cst_12 = arith.constant 9.99999974E-6 : f32
    %20 = vector.broadcast %cst_12 : f32 to vector<1x128xf32>
    %21 = arith.addf %19, %20 : vector<1x128xf32>
    %22 = math.rsqrt %21 : vector<1x128xf32>
    %23 = arith.mulf %4, %22 : vector<1x128xf32>
    %24 = arith.mulf %10, %23 : vector<1x128xf32>
    %25 = arith.subf %5, %24 : vector<1x128xf32>
    %26 = vector.broadcast %23 : vector<1x128xf32> to vector<8x128xf32>
    %27 = arith.mulf %3, %26 : vector<8x128xf32>
    %28 = vector.broadcast %25 : vector<1x128xf32> to vector<8x128xf32>
    %29 = arith.addf %27, %28 : vector<8x128xf32>
    %cst_13 = arith.constant 0.000000e+00 : f32
    %30 = vector.broadcast %cst_13 : f32 to vector<8x128xf32>
    %31 = arith.maximumf %29, %30 : vector<8x128xf32>
    %32 = arith.truncf %31 : vector<8x128xf32> to vector<8x128xbf16>
    %c0_14 = arith.constant 0 : index
    %c0_15 = arith.constant 0 : index
    %33 = vector.load %arg3[%c0_14, %c0_15] : memref<128x128xbf16, #tpu.memory_space<vmem>>, vector<128x128xbf16>
    %cst_16 = arith.constant dense<0.000000e+00> : vector<8x128xf32>
    %34 = tpu.matmul %32, %33, %cst_16 {dimension_numbers = #tpu.dot_dimension_numbers<[1], [0], [0], [1], [0, 0, 1, 1], [], []>} : vector<8x128xbf16>, vector<128x128xbf16>, vector<8x128xf32> -> vector<8x128xf32>
    %35 = vector.broadcast %6 : vector<1x128xf32> to vector<8x128xf32>
    %36 = arith.addf %34, %35 : vector<8x128xf32>
    %c0_17 = arith.constant 0 : index
    %c0_18 = arith.constant 0 : index
    %37 = vector.load %arg5[%c0_17, %c0_18] : memref<8x128xf32, #tpu.memory_space<vmem>>, vector<8x128xf32>
    tpu.vector_store %arg5[%c0_17, %c0_18], %36 {strides = array<i32>} : memref<8x128xf32, #tpu.memory_space<vmem>>, vector<8x128xf32>,
    return
  }
  func.func @transform_0(%arg0: i32) -> (i32, i32) {
    %c0_i32 = arith.constant 0 : i32
    %c0_i32_0 = arith.constant 0 : i32
    %c0_i32_1 = arith.constant 0 : i32
    return %c0_i32, %c0_i32_0 : i32, i32
  }
  func.func @transform_1(%arg0: i32) -> (i32, i32) {
    %c0_i32 = arith.constant 0 : i32
    %c0_i32_0 = arith.constant 0 : i32
    %c0_i32_1 = arith.constant 0 : i32
    return %c0_i32, %c0_i32_0 : i32, i32
  }
  func.func @transform_2(%arg0: i32) -> (i32, i32) {
    %c0_i32 = arith.constant 0 : i32
    %c0_i32_0 = arith.constant 0 : i32
    %c0_i32_1 = arith.constant 0 : i32
    return %c0_i32, %c0_i32_0 : i32, i32
  }
  func.func @transform_3(%arg0: i32) -> (i32, i32) {
    %c0_i32 = arith.constant 0 : i32
    %c0_i32_0 = arith.constant 0 : i32
    %c0_i32_1 = arith.constant 0 : i32
    return %c0_i32, %c0_i32_0 : i32, i32
  }
  func.func @transform_4(%arg0: i32) -> (i32, i32) {
    %c0_i32 = arith.constant 0 : i32
    %c0_i32_0 = arith.constant 0 : i32
    %c0_i32_1 = arith.constant 0 : i32
    return %c0_i32, %c0_i32_0 : i32, i32
  }
}

</mosaic_0001>

<bundles_post_ra>
// kernel: tpu_custom_call.1
= control target key start
LH: loop header
LB: loop body
LE: loop exit
PB: predicated region body
PF: predicated region fallthrough
CT: control target
= control target key end

     0   :  { %9 = vsyncpa [#allocation3], 0  ;;  %s571_s0 = inlined_call_operand.hbm [shape: f32[8,128], index: 0, kind: input, shape index: {}]   ;;  %s572_s1 = inlined_call_operand.hbm [shape: bf16[128,128], index: 1, kind: input, shape index: {}]   ;;  %s573_s2 = inlined_call_operand.hbm [shape: bf16[128,128], index: 2, kind: input, shape index: {}]   ;;  %s574_s3 = inlined_call_operand.hbm [shape: f32[3,128], index: 3, kind: input, shape index: {}]   ;;  %s575_s4 = inlined_call_operand.hbm [shape: f32[8,128], index: 4, kind: output, shape index: {}]  }
   0x1   :  { %10 = vsyncpa [#allocation6], 0 }
   0x2   :  { %11 = vsyncpa [#allocation9], 0  ;;  %s28_s17 = sshll.u32 %s572_s1, 4  ;;  %s29_s17 = int_to_ptr.hbm [resolvable:$true] %s28_s17 }
   0x3   :  { %12 = vsyncpa [#allocation4], 0  ;;  %s523_s18 = smov [#allocation5]   ;;  %s18_s22 = sshll.u32 %s571_s0, 4  ;;  %s19_s22 = int_to_ptr.hbm [resolvable:$true] %s18_s22 }
   0x4   :  { %s30_s19 = sshll.u32 %s523_s18, 4  ;;  %s524_s23 = smov 64   ;;  %s31_s19 = int_to_ptr.vmem [resolvable:$true] %s30_s19 }
   0x5   :  { %s525_s24 = smov 4   ;;  %s526_s25 = smov [#allocation2]  }
   0x6   :  { %36 = dma.hbm_to_vmem [thread:$0]  %s29_s17, 1024, %s31_s19, [#allocation6], %s524_s23, %s524_s23, %s525_s24  }
   0x7   :  { %s20_s26 = sshll.u32 %s526_s25, 4  ;;  %s41_s29 = sshll.u32 %s573_s2, 4  ;;  %s21_s26 = int_to_ptr.vmem [resolvable:$true] %s20_s26  ;;  %s42_s29 = int_to_ptr.hbm [resolvable:$true] %s41_s29 }
   0x8   :  { %23 = dma.hbm_to_vmem [thread:$0]  %s19_s22, 128, %s21_s26, [#allocation3]  }
   0x9   :  { %s55_s5 = sshll.u32 %s574_s3, 4  ;;  %s527_s6 = smov [#allocation7]   ;;  %s56_s5 = int_to_ptr.hbm [resolvable:$true] %s55_s5 }
   0xa   :  { %s43_s7 = sshll.u32 %s527_s6, 4  ;;  %s528_s0 = smov [#allocation8]   ;;  %s44_s7 = int_to_ptr.vmem [resolvable:$true] %s43_s7 }
   0xb   :  { %49 = dma.hbm_to_vmem [thread:$0]  %s42_s29, 1024, %s44_s7, [#allocation6], %s524_s23, %s524_s23, %s525_s24  }
   0xc   :  { %s57_s8 = sshll.u32 %s528_s0, 4  ;;  %s58_s8 = int_to_ptr.vmem [resolvable:$true] %s57_s8 }
   0xd   :  { %60 = dma.hbm_to_vmem [thread:$0]  %s56_s5, 64, %s58_s8, [#allocation9]  }
   0xe   :  { %515 = dma.done.wait [#allocation3], 128  }
   0xf   :  { %516 = vsyncadd [#allocation3], 4294967168 }
  0x10   :  { %517 = dma.done.wait [#allocation6], 2048  }
  0x11   :  { %518 = vsyncadd [#allocation6], 4294965248 }
  0x12   :  { %519 = dma.done.wait [#allocation9], 64  }
  0x13   :  { %520 = vsyncadd [#allocation9], 4294967232  ;;  %v373_v0 = vld [vmem:[#allocation5 + $0x38] sm:$0xff]  ;;  %v372_v1 = vld [vmem:[#allocation5 + $0x30] sm:$0xff]  ;;  %v529_v12 = vmov 8.0   ;;  %s530_s2 = smov [#allocation10]  }
  0x14   :  { %143 = vmatpush.bf16.msra.mxu0 %v373_v0  ;;  %v371_v2 = vld [vmem:[#allocation5 + $0x28] sm:$0xff]  ;;  %v370_v3 = vld [vmem:[#allocation5 + $0x20] sm:$0xff]  ;;  %v369_v4 = vld [vmem:[#allocation5 + $0x18] sm:$0xff]  ;;  %391 = vrcp.f32 %v529_v12  ;;  %s288_s3 = sshll.u32 %s530_s2, 4  ;;  %s290_s11 = sshll.u32 %s575_s4, 4  ;;  %s289_s3 = int_to_ptr.vmem [resolvable:$true] %s288_s3  ;;  %s291_s11 = int_to_ptr.hbm [resolvable:$true] %s290_s11 }
  0x15   :  { %v368_v5 = vld [vmem:[#allocation5 + $0x10] sm:$0xff]  ;;  %v367_v6 = vld [vmem:[#allocation5 + $0x8] sm:$0xff]  ;;  %v366_v7 = vld [vmem:[#allocation5] sm:$0xff] }
  0x16   :  { %v77_v8 = vld [vmem:[#allocation2] sm:$0xff]  ;;  %v380_v11 = vld [vmem:[#allocation7 + $0x30] sm:$0xff]  ;;  %v379_v13 = vld [vmem:[#allocation7 + $0x28] sm:$0xff] }
  0x17   :  { %v78_v9 = vpack.c.bf16 %v77_v8, %v77_v8  ;;  %v381_v10 = vld [vmem:[#allocation7 + $0x38] sm:$0xff]  ;;  %v378_v15 = vld [vmem:[#allocation7 + $0x20] sm:$0xff]  ;;  %v376_v19 = vld [vmem:[#allocation7 + $0x10] sm:$0xff] }
  0x18   :  { %144 = vmatpush.bf16.msra.mxu0 %v372_v1  ;;  %269 = vmatpush.bf16.msra.mxu1 %v381_v10  ;;  %v377_v17 = vld [vmem:[#allocation7 + $0x18] sm:$0xff]  ;;  %v375_v26 = vld [vmem:[#allocation7 + $0x8] sm:$0xff]  ;;  %v374_v32 = vld [vmem:[#allocation7] sm:$0xff] }
  0x19   :  { %v156_v51 = vld [vmem:[#allocation8] sm:$0x1]  ;;  %v157_v55 = vld [vmem:[#allocation8 + $0x1] sm:$0x1]  ;;  %v390_v0 = vld [vmem:[#allocation8 + $0x2] ss:$0 sm:$0xff] }
  0x1a   :  { %v392_v14 = vpop.eup %391 }
  0x1b   :  { %v166_v16 = vmul.f32 8.0, %v392_v14  ;;  %vm170_vm0 = vweird.f32 %v392_v14 }
  0x1c   :  { %145 = vmatpush.bf16.msra.mxu0 %v371_v2  ;;  %270 = vmatpush.bf16.msra.mxu1 %v380_v11 }
  0x1d   :  { %v167_v18 = vsub.f32 1.0, %v166_v16 }
  0x1f   :  { %v168_v23 = vmul.f32 %v392_v14, %v167_v18 }
  0x20   :  { %146 = vmatpush.bf16.msra.mxu0 %v370_v3  ;;  %271 = vmatpush.bf16.msra.mxu1 %v379_v13 }
  0x21   :  { %v169_v29 = vadd.f32 %v392_v14, %v168_v23 }
  0x23   :  { %v171_v36 = vsel %vm170_vm0, %v392_v14, %v169_v29 }
  0x24   :  { %147 = vmatpush.bf16.msra.mxu0 %v369_v4  ;;  %272 = vmatpush.bf16.msra.mxu1 %v378_v15 }
  0x28   :  { %148 = vmatpush.bf16.msra.mxu0 %v368_v5  ;;  %273 = vmatpush.bf16.msra.mxu1 %v377_v17 }
  0x2c   :  { %149 = vmatpush.bf16.msra.mxu0 %v367_v6  ;;  %274 = vmatpush.bf16.msra.mxu1 %v376_v19 }
  0x30   :  { %150 = vmatpush.bf16.msra.mxu0 %v366_v7  ;;  %275 = vmatpush.bf16.msra.mxu1 %v375_v26 }
  0x33   :  { %151 = vmatmul.bf16.vlgmr.msra.gmra.mxu0 %v78_v9 }
  0x34   :  { %276 = vmatpush.bf16.msra.mxu1 %v374_v32 }
  0xb0   :  { %v152_v20 = vpop.f32.mrf.mxu0 }
  0xb1   :  { %v159_v21 = vrot.slane %v152_v20, 4  ;;  %v173_v22 = vmul.f32 %v152_v20, %v152_v20 }
  0xb3   :  { %v160_v24 = vadd.f32 %v159_v21, %v152_v20  ;;  %v174_v25 = vrot.slane %v173_v22, 4 }
  0xb5   :  { %v161_v27 = vrot.slane %v160_v24, 2  ;;  %v175_v28 = vadd.f32 %v174_v25, %v173_v22 }
  0xb7   :  { %v162_v30 = vadd.f32 %v161_v27, %v160_v24  ;;  %v176_v31 = vrot.slane %v175_v28, 2 }
  0xb8   :  { %v154_v33 = vpop.f32.mrf.mxu0 }
  0xb9   :  { %v163_v34 = vrot.slane %v162_v30, 1  ;;  %v177_v35 = vadd.f32 %v176_v31, %v175_v28 }
  0xbb   :  { %v164_v37 = vadd.f32 %v163_v34, %v162_v30  ;;  %v178_v38 = vrot.slane %v177_v35, 1 }
  0xbd   :  { %v179_v39 = vadd.f32 %v178_v38, %v177_v35  ;;  %v172_v40 = vmul.f32 %v171_v36, %v164_v37 }
  0xbf   :  { %v180_v41 = vmul.f32 %v179_v39, %v171_v36  ;;  %v181_v42 = vmul.f32 %v172_v40, %v172_v40 }
  0xc1   :  { %v182_v43 = vsub.f32 %v180_v41, %v181_v42 }
  0xc3   :  { %v183_v44 = vmax.f32 %v182_v43, 0.0 }
  0xc5   :  { %v184_v45 = vadd.f32 1e-05, %v183_v44 }
  0xc7   :  { %393 = vrsqrt.f32 %v184_v45  ;;  %vm191_vm2 = vweird.f32 %v184_v45 }
  0xcd   :  { %v394_v46 = vpop.eup %393 }
  0xce   :  { %v186_v47 = vmul.f32 %v394_v46, %v184_v45  ;;  %vm192_vm1 = vweird.f32 %v394_v46 }
  0xcf   :  { %vm193_vm3 = vmor %vm191_vm2, %vm192_vm1 }
  0xd0   :  { %v187_v48 = vmul.f32 %v394_v46, %v186_v47 }
  0xd2   :  { %v188_v49 = vmul.f32 0.5, %v187_v48 }
  0xd4   :  { %v189_v50 = vsub.f32 1.5, %v188_v49 }
  0xd6   :  { %v190_v52 = vmul.f32 %v394_v46, %v189_v50 }
  0xd8   :  { %v194_v53 = vsel %vm193_vm3, %v394_v46, %v190_v52 }
  0xd9   :  { %v195_v54 = vmul.f32 %v194_v53, %v156_v51 }
  0xdb   :  { %v196_v56 = vmul.f32 %v195_v54, %v172_v40  ;;  %v198_v57 = vperm.slane %v195_v54, 0 }
  0xdd   :  { %v197_v58 = vsub.f32 %v157_v55, %v196_v56  ;;  %v199_v59 = vmul.f32 %v198_v57, %v152_v20 }
  0xdf   :  { %v200_v60 = vperm.slane %v197_v58, 0 }
  0xe1   :  { %v201_v61 = vadd.f32 %v200_v60, %v199_v59 }
  0xe3   :  { %v202_v62 = vmax.f32 %v201_v61, 0.0 }
  0xe5   :  { %v203_v63 = vpack.c.bf16 %v202_v62, %v202_v62 }
  0xe7   :  { %277 = vmatmul.bf16.vlgmr.msra.gmra.mxu1 %v203_v63 }
 0x164   :  { %v278_v1 = vpop.f32.mrf.mxu1 }
 0x165   :  { %v279_v2 = vadd.f32 %v390_v0, %v278_v1 }
 0x167   :  { %282 = vst [vmem:[#allocation10] sm:$0xff] %v279_v2 }
 0x168   :  { %293 = dma.vmem_to_hbm [thread:$0]  %s289_s3, 128, %s291_s11, [#allocation4]  }
 0x16c   :  { %v280_v3 = vpop.f32.mrf.mxu1 }
 0x16d   :  { %521 = dma.done.wait [#allocation4], 128  }
 0x16e   :  { %522 = vsyncadd [#allocation4], 4294967168 }
 0x16f   :  { %298 = vsyncpa [#allocation3], 1 }
 0x170   :  { %299 = vsyncpa [#allocation6], 1 }
 0x171   :  { %300 = vsyncpa [#allocation9], 1 }
 0x172   :  { %301 = vsyncpa [#allocation4], 1 }

</bundles_post_ra>
